<compile_context>
chip_gen: v6e
topology: v6e:2x2x1
jax: 0.10.0
libtpu: 0.0.40
codegen_flags: <defaults>
</compile_context>

<pallas_src>
import functools

import jax
import jax.numpy as jnp
import numpy as np
from jax import lax
from jax.experimental import pallas as pl
from jax.experimental.pallas import tpu as pltpu

KSIZE = 3  # 3x3 conv, padding = KSIZE // 2 = 1 ("same" conv as in default_conv)


def _resblock_kernel(x_ref, w1_ref, b1_ref, w2_ref, b2_ref, o_ref, *,
                     img_rows, res_scale):
    """Processes `imgs_per_block` whole images per grid step.

    x_ref  : (TR, W*C)      lane-dense f32 input rows (TR = imgs_per_block * H)
    w*_ref : (3*W*C, W*C)   block-banded conv weights (bf16 or f32)
    b*_ref : (1, W*C)       f32 bias, pre-tiled across the W positions
    o_ref  : (TR, W*C)      lane-dense f32 output rows
    """
    TR, WC = x_ref.shape

    # Per-image top / bottom row masks for the kh = -1 / +1 taps (zero padding in H).
    # O(1) VPU work: row-within-image via modulo (bitwise AND for power-of-two H),
    # built at shape (TR, 1) and broadcast inside the where.
    row = lax.broadcasted_iota(jnp.int32, (TR, 1), 0)
    if img_rows & (img_rows - 1) == 0:
        r_in_img = jnp.bitwise_and(row, img_rows - 1)
    else:
        r_in_img = row % img_rows
    is_top = r_in_img == 0
    is_bot = r_in_img == img_rows - 1

    def conv3x3(v, w_ref, b_ref):
        # v[r] holds image row h; the conv needs rows h-1 / h / h+1.  Row shifts are
        # circular sublane rotates (non-negative shifts only) + boundary masks; kw
        # taps / W-padding live inside the banded weight, so the whole conv is a
        # single MXU push with f32 accumulation.
        up = jnp.where(is_top, 0.0, pltpu.roll(v, shift=1, axis=0))        # x[h-1, :]
        dn = jnp.where(is_bot, 0.0, pltpu.roll(v, shift=TR - 1, axis=0))   # x[h+1, :]
        patches = jnp.concatenate([up, v, dn], axis=-1)                    # (TR, 3*W*C)
        out = jnp.dot(patches.astype(w_ref.dtype), w_ref[...],
                      preferred_element_type=jnp.float32)                  # (TR, W*C) f32
        return out + b_ref[...]                                            # f32 bias bcast

    x = x_ref[...]
    h1 = jnp.maximum(conv3x3(x, w1_ref, b1_ref), 0.0)   # conv1 + bias + ReLU
    res = conv3x3(h1, w2_ref, b2_ref)                   # conv2 + bias
    if res_scale != 1.0:                                 # trace-time branch
        res = res * res_scale
    o_ref[...] = (res + x).astype(o_ref.dtype)           # residual add (f32 exact)


def _build_banded_weight(w_oihw, W):
    """(C_out, C_in, 3, 3) PyTorch weight -> (3*W*C, W*C) block-banded matrix.

    BigW[kh*W*C + w'*C + ci, w*C + co] = weight[co, ci, kh, kw] where kw = w' - w + 1
    (and 0 outside the band), so  patches @ BigW  realises the full 3x3 conv with
    implicit zero padding along W.
    """
    wt = jnp.transpose(w_oihw, (2, 3, 1, 0)).astype(jnp.float32)      # (kh, kw, ci, co)
    C = wt.shape[2]
    bands = jnp.stack(
        [jnp.eye(W, W, k=1 - kw, dtype=jnp.float32) for kw in range(KSIZE)])  # (3, W, W)
    big = jnp.einsum('kpw,dkio->dpiwo', bands, wt)                    # (3, W, C, W, C)
    return big.reshape(KSIZE * W * C, W * C)


def _pick_imgs_per_block(B, H):
    """Target >= ~512 rows per grid step, cap at 2048 rows (v7x VMEM headroom),
    keep >= 2 grid steps so both v7x TensorCores get work, and divide B."""
    max_rows = 2048
    target_rows = 512
    ipb = max(1, min(B, max_rows // H, max(1, target_rows // H)))
    while B % ipb:
        ipb -= 1
    if B // ipb < 2 and B >= 2:
        ipb = max(1, B // 2)
        while B % ipb:
            ipb -= 1
    return max(ipb, 1)


def resblock_pallas(x_nchw, w1, b1, w2, b2, *, res_scale=1.0, imgs_per_block=None,
                    compute_dtype=jnp.bfloat16):
    """x_nchw: (B, C, H, W) float32.  w*: (C_out, C_in, 3, 3) (PyTorch layout).

    compute_dtype controls the MXU operand dtype (bf16 = fast path; f32 = exact).
    Accumulation, bias add and residual add are always f32.
    """
    B, C, H, W = x_nchw.shape
    WC = W * C
    assert WC % 128 == 0, (
        f"lane-dense layout needs W*C to be a multiple of 128 (got {WC}); other "
        "shapes would fall into masked partial stores")

    if imgs_per_block is None:
        imgs_per_block = _pick_imgs_per_block(B, H)
    assert B % imgs_per_block == 0, "imgs_per_block must divide the batch"
    TR = imgs_per_block * H            # rows per grid step (whole images only)
    assert TR % 8 == 0, "rows-per-block must be a multiple of 8 (sublane tiling)"

    # NCHW -> NHWC -> lane-dense (B*H, W*C): channels ride the fast lane axis.
    x_rows = jnp.transpose(x_nchw, (0, 2, 3, 1)).reshape(B * H, WC).astype(jnp.float32)

    big_w1 = _build_banded_weight(w1, W).astype(compute_dtype)   # (3*WC, WC)
    big_w2 = _build_banded_weight(w2, W).astype(compute_dtype)
    b1_l = jnp.tile(b1.astype(jnp.float32), W).reshape(1, WC)
    b2_l = jnp.tile(b2.astype(jnp.float32), W).reshape(1, WC)

    kernel = functools.partial(_resblock_kernel, img_rows=H,
                               res_scale=float(res_scale))

    out_rows = pl.pallas_call(
        kernel,
        out_shape=jax.ShapeDtypeStruct((B * H, WC), jnp.float32),
        grid_spec=pltpu.PrefetchScalarGridSpec(
            num_scalar_prefetch=0,
            grid=(B * H // TR,),
            in_specs=[
                pl.BlockSpec((TR, WC), lambda i: (i, 0)),              # x rows
                pl.BlockSpec((KSIZE * WC, WC), lambda i: (0, 0)),      # BigW1 (resident)
                pl.BlockSpec((1, WC), lambda i: (0, 0)),               # bias1 (resident)
                pl.BlockSpec((KSIZE * WC, WC), lambda i: (0, 0)),      # BigW2 (resident)
                pl.BlockSpec((1, WC), lambda i: (0, 0)),               # bias2 (resident)
            ],
            out_specs=pl.BlockSpec((TR, WC), lambda i: (i, 0)),
        ),
        compiler_params=pltpu.CompilerParams(
            dimension_semantics=("parallel",)),
    )(x_rows, big_w1, b1_l, big_w2, b2_l)

    # lane-dense -> NHWC -> NCHW to match the PyTorch output convention.
    return jnp.transpose(out_rows.reshape(B, H, W, C), (0, 3, 1, 2))


def resblock_reference(x_nchw, w1, b1, w2, b2, *, res_scale=1.0):
    """Pure-JAX reference replicating the PyTorch module exactly (NCHW, f32)."""
    dn = ("NCHW", "OIHW", "NCHW")

    def conv(x, w, b):
        y = lax.conv_general_dilated(x, w, window_strides=(1, 1),
                                     padding=((1, 1), (1, 1)),
                                     dimension_numbers=dn)
        return y + b.reshape(1, -1, 1, 1)

    h = jnp.maximum(conv(x_nchw, w1, b1), 0.0)
    res = conv(h, w2, b2) * res_scale
    return res + x_nchw


if __name__ == "__main__":
    B, C, H, W = 4, 8, 16, 16     # n_feats = 8, kernel_size = 3 -> W*C = 128 lanes
    res_scale = 1.0               # module default

    key = jax.random.PRNGKey(0)
    kx, kw1, kb1, kw2, kb2 = jax.random.split(key, 5)

    x = jax.random.normal(kx, (B, C, H, W), dtype=jnp.float32)
    # Deterministic synthetic parameters (PyTorch conv layout: OIHW).
    w1 = jax.random.normal(kw1, (C, C, KSIZE, KSIZE), dtype=jnp.float32) * 0.1
    b1 = jax.random.normal(kb1, (C,), dtype=jnp.float32) * 0.1
    w2 = jax.random.normal(kw2, (C, C, KSIZE, KSIZE), dtype=jnp.float32) * 0.1
    b2 = jax.random.normal(kb2, (C,), dtype=jnp.float32) * 0.1

    ref = jax.block_until_ready(
        resblock_reference(x, w1, b1, w2, b2, res_scale=res_scale))

    # 1) Exactness check: f32 MXU operands (same math as PyTorch up to f32 rounding).
    out_f32 = jax.block_until_ready(
        resblock_pallas(x, w1, b1, w2, b2, res_scale=res_scale,
                        compute_dtype=jnp.float32))
    np.testing.assert_allclose(np.asarray(out_f32), np.asarray(ref),
                               rtol=1e-3, atol=1e-3)

    # 2) Performance configuration: bf16 MXU operands, f32 accumulation + residual.
    out_bf16 = jax.block_until_ready(
        resblock_pallas(x, w1, b1, w2, b2, res_scale=res_scale))   # default bf16
    np.testing.assert_allclose(np.asarray(out_bf16), np.asarray(ref),
                               rtol=5e-2, atol=5e-2)               # bf16 operand rounding

    print("KERNEL_OK")
</pallas_src>

<mosaic_0001>
module attributes {stable_mosaic.version = 11 : i64} {
  func.func @_resblock_kernel(%arg0: i32, %arg1: memref<32x128xf32, #tpu.memory_space<vmem>>, %arg2: memref<384x128xf32, #tpu.memory_space<vmem>>, %arg3: memref<1x128xf32, #tpu.memory_space<vmem>>, %arg4: memref<384x128xf32, #tpu.memory_space<vmem>>, %arg5: memref<1x128xf32, #tpu.memory_space<vmem>>, %arg6: memref<32x128xf32, #tpu.memory_space<vmem>>) attributes {dimension_semantics = [#tpu.dimension_semantics<parallel>], iteration_bounds = array<i64: 2>, scalar_prefetch = 0 : i64, scratch_operands = 0 : i64, tpu.core_type = #tpu.core_type<tc>, window_params = [{transform_indices = @transform_0, window_bounds = array<i64: 32, 128>}, {pipeline_mode = #tpu.pipeline_mode<synchronous>, transform_indices = @transform_1, window_bounds = array<i64: 384, 128>}, {pipeline_mode = #tpu.pipeline_mode<synchronous>, transform_indices = @transform_2, window_bounds = array<i64: 1, 128>}, {pipeline_mode = #tpu.pipeline_mode<synchronous>, transform_indices = @transform_3, window_bounds = array<i64: 384, 128>}, {pipeline_mode = #tpu.pipeline_mode<synchronous>, transform_indices = @transform_4, window_bounds = array<i64: 1, 128>}, {transform_indices = @transform_5, window_bounds = array<i64: 32, 128>}]} {
    %0 = tpu.iota {dimensions = array<i32: 0>} : vector<32x1xi32>
    %c15_i32 = arith.constant 15 : i32
    %1 = vector.broadcast %c15_i32 : i32 to vector<32x1xi32>
    %2 = arith.andi %0, %1 : vector<32x1xi32>
    %c0_i32 = arith.constant 0 : i32
    %3 = vector.broadcast %c0_i32 : i32 to vector<32x1xi32>
    %4 = arith.cmpi eq, %2, %3 : vector<32x1xi32>
    %c15_i32_0 = arith.constant 15 : i32
    %5 = vector.broadcast %c15_i32_0 : i32 to vector<32x1xi32>
    %6 = arith.cmpi eq, %2, %5 : vector<32x1xi32>
    %c0 = arith.constant 0 : index
    %c0_1 = arith.constant 0 : index
    %7 = vector.load %arg1[%c0, %c0_1] : memref<32x128xf32, #tpu.memory_space<vmem>>, vector<32x128xf32>
    %c1_i32 = arith.constant 1 : i32
    %8 = tpu.dynamic_rotate %7 by %c1_i32 dim 0 : vector<32x128xf32>, i32 -> vector<32x128xf32>
    %cst = arith.constant 0.000000e+00 : f32
    %9 = vector.shape_cast %4 : vector<32x1xi1> to vector<32x1xi1>
    %10 = vector.broadcast %9 : vector<32x1xi1> to vector<32x128xi1>
    %11 = vector.broadcast %cst : f32 to vector<32x128xf32>
    %12 = arith.select %10, %11, %8 : vector<32x128xi1>, vector<32x128xf32>
    %c31_i32 = arith.constant 31 : i32
    %13 = tpu.dynamic_rotate %7 by %c31_i32 dim 0 : vector<32x128xf32>, i32 -> vector<32x128xf32>
    %cst_2 = arith.constant 0.000000e+00 : f32
    %14 = vector.shape_cast %6 : vector<32x1xi1> to vector<32x1xi1>
    %15 = vector.broadcast %14 : vector<32x1xi1> to vector<32x128xi1>
    %16 = vector.broadcast %cst_2 : f32 to vector<32x128xf32>
    %17 = arith.select %15, %16, %13 : vector<32x128xi1>, vector<32x128xf32>
    %18 = tpu.concatenate %12, %7, %17 in 1 : vector<32x128xf32>, vector<32x128xf32>, vector<32x128xf32> -> vector<32x384xf32>
    %c0_3 = arith.constant 0 : index
    %c0_4 = arith.constant 0 : index
    %19 = vector.load %arg2[%c0_3, %c0_4] : memref<384x128xf32, #tpu.memory_space<vmem>>, vector<384x128xf32>
    %cst_5 = arith.constant dense<0.000000e+00> : vector<32x128xf32>
    %20 = tpu.matmul %18, %19, %cst_5 {dimension_numbers = #tpu.dot_dimension_numbers<[1], [0], [0], [1], [0, 0, 1, 1], [], []>} : vector<32x384xf32>, vector<384x128xf32>, vector<32x128xf32> -> vector<32x128xf32>
    %c0_6 = arith.constant 0 : index
    %c0_7 = arith.constant 0 : index
    %21 = vector.load %arg3[%c0_6, %c0_7] : memref<1x128xf32, #tpu.memory_space<vmem>>, vector<1x128xf32>
    %22 = vector.broadcast %21 : vector<1x128xf32> to vector<32x128xf32>
    %23 = arith.addf %20, %22 : vector<32x128xf32>
    %cst_8 = arith.constant 0.000000e+00 : f32
    %24 = vector.broadcast %cst_8 : f32 to vector<32x128xf32>
    %25 = arith.maximumf %23, %24 : vector<32x128xf32>
    %c1_i32_9 = arith.constant 1 : i32
    %26 = tpu.dynamic_rotate %25 by %c1_i32_9 dim 0 : vector<32x128xf32>, i32 -> vector<32x128xf32>
    %cst_10 = arith.constant 0.000000e+00 : f32
    %27 = vector.shape_cast %4 : vector<32x1xi1> to vector<32x1xi1>
    %28 = vector.broadcast %27 : vector<32x1xi1> to vector<32x128xi1>
    %29 = vector.broadcast %cst_10 : f32 to vector<32x128xf32>
    %30 = arith.select %28, %29, %26 : vector<32x128xi1>, vector<32x128xf32>
    %c31_i32_11 = arith.constant 31 : i32
    %31 = tpu.dynamic_rotate %25 by %c31_i32_11 dim 0 : vector<32x128xf32>, i32 -> vector<32x128xf32>
    %cst_12 = arith.constant 0.000000e+00 : f32
    %32 = vector.shape_cast %6 : vector<32x1xi1> to vector<32x1xi1>
    %33 = vector.broadcast %32 : vector<32x1xi1> to vector<32x128xi1>
    %34 = vector.broadcast %cst_12 : f32 to vector<32x128xf32>
    %35 = arith.select %33, %34, %31 : vector<32x128xi1>, vector<32x128xf32>
    %36 = tpu.concatenate %30, %25, %35 in 1 : vector<32x128xf32>, vector<32x128xf32>, vector<32x128xf32> -> vector<32x384xf32>
    %c0_13 = arith.constant 0 : index
    %c0_14 = arith.constant 0 : index
    %37 = vector.load %arg4[%c0_13, %c0_14] : memref<384x128xf32, #tpu.memory_space<vmem>>, vector<384x128xf32>
    %cst_15 = arith.constant dense<0.000000e+00> : vector<32x128xf32>
    %38 = tpu.matmul %36, %37, %cst_15 {dimension_numbers = #tpu.dot_dimension_numbers<[1], [0], [0], [1], [0, 0, 1, 1], [], []>} : vector<32x384xf32>, vector<384x128xf32>, vector<32x128xf32> -> vector<32x128xf32>
    %c0_16 = arith.constant 0 : index
    %c0_17 = arith.constant 0 : index
    %39 = vector.load %arg5[%c0_16, %c0_17] : memref<1x128xf32, #tpu.memory_space<vmem>>, vector<1x128xf32>
    %40 = vector.broadcast %39 : vector<1x128xf32> to vector<32x128xf32>
    %41 = arith.addf %38, %40 : vector<32x128xf32>
    %42 = arith.addf %41, %7 : vector<32x128xf32>
    %c0_18 = arith.constant 0 : index
    %c0_19 = arith.constant 0 : index
    %43 = vector.load %arg6[%c0_18, %c0_19] : memref<32x128xf32, #tpu.memory_space<vmem>>, vector<32x128xf32>
    tpu.vector_store %arg6[%c0_18, %c0_19], %42 {strides = array<i32>} : memref<32x128xf32, #tpu.memory_space<vmem>>, vector<32x128xf32>,
    return
  }
  func.func @transform_0(%arg0: i32) -> (i32, i32) {
    %c0_i32 = arith.constant 0 : i32
    %c0_i32_0 = arith.constant 0 : i32
    return %arg0, %c0_i32 : i32, i32
  }
  func.func @transform_1(%arg0: i32) -> (i32, i32) {
    %c0_i32 = arith.constant 0 : i32
    %c0_i32_0 = arith.constant 0 : i32
    %c0_i32_1 = arith.constant 0 : i32
    return %c0_i32, %c0_i32_0 : i32, i32
  }
  func.func @transform_2(%arg0: i32) -> (i32, i32) {
    %c0_i32 = arith.constant 0 : i32
    %c0_i32_0 = arith.constant 0 : i32
    %c0_i32_1 = arith.constant 0 : i32
    return %c0_i32, %c0_i32_0 : i32, i32
  }
  func.func @transform_3(%arg0: i32) -> (i32, i32) {
    %c0_i32 = arith.constant 0 : i32
    %c0_i32_0 = arith.constant 0 : i32
    %c0_i32_1 = arith.constant 0 : i32
    return %c0_i32, %c0_i32_0 : i32, i32
  }
  func.func @transform_4(%arg0: i32) -> (i32, i32) {
    %c0_i32 = arith.constant 0 : i32
    %c0_i32_0 = arith.constant 0 : i32
    %c0_i32_1 = arith.constant 0 : i32
    return %c0_i32, %c0_i32_0 : i32, i32
  }
  func.func @transform_5(%arg0: i32) -> (i32, i32) {
    %c0_i32 = arith.constant 0 : i32
    %c0_i32_0 = arith.constant 0 : i32
    return %arg0, %c0_i32 : i32, i32
  }
}

</mosaic_0001>

<bundles_post_ra>
// kernel: tpu_custom_call.1
= control target key start
LH: loop header
LB: loop body
LE: loop exit
PB: predicated region body
PF: predicated region fallthrough
CT: control target
= control target key end

     0   :  { %10 = vsyncpa [#allocation3], 0  ;;  %s1747_s0 = inlined_call_operand.hbm [shape: f32[64,128], index: 0, kind: input, shape index: {}]   ;;  %s1748_s1 = inlined_call_operand.hbm [shape: f32[384,128], index: 1, kind: input, shape index: {}]   ;;  %s1749_s2 = inlined_call_operand.vmem [shape: f32[1,128], index: 2, kind: input, shape index: {}]   ;;  %s1750_s3 = inlined_call_operand.hbm [shape: f32[384,128], index: 3, kind: input, shape index: {}]   ;;  %s1751_s4 = inlined_call_operand.vmem [shape: f32[1,128], index: 4, kind: input, shape index: {}]   ;;  %s1752_s5 = inlined_call_operand.hbm [shape: f32[64,128], index: 5, kind: output, shape index: {}]  }
   0x1   :  { %12 = vsyncpa [#allocation3 + $0x1], 0 }
   0x2   :  { %13 = vsyncpa [#allocation6], 0 }
   0x3   :  { %14 = vsyncpa [#allocation4], 0 }
   0x4   :  { %16 = vsyncpa [#allocation4 + $0x1], 0  ;;  %s1434_s18 = smov 0   ;;  %s1436_s19 = smov 0  }
   0x5   :  { %s1438_s20 = smov 0   ;;  %s1440_s21 = smov 0  }
   0x6 LB: > { %s1455_s22 = sadd.s32 4294967295, %s1394_s21   ;;  %s929_s23 = sadd.s32 4294967294, %s1394_s21   ;;  %s1394_s21 = sphi %s1440_s21, %s1783_s21   ;;  %s1390_s20 = sphi %s1438_s20, %s1782_s20   ;;  %s1386_s19 = sphi %s1436_s19, %s1781_s19   ;;  %s1382_s18 = sphi %s1434_s18, %s1780_s18  }
   0x7   : > { %p42_p0 = scmp.ne.s32.totalorder %s1386_s19, %s1382_s18  ;;  %p1753_p1 = scmp.eq.s32.totalorder %s1455_s22, 0 }
   0x8   : > { %p150_p2 = scmp.eq.s32.totalorder %s1455_s22, 1  ;;  %p156_p3 = scmp.eq.s32.totalorder %s929_s23, 1 }
   0x9   : > { %p1464_p4 = por %p1753_p1, %p42_p0  ;;  %p930_p5 = scmp.ge.s32.totalorder %s1394_s21, 1 }
   0xa   : > { %p1469_p6 = por %p156_p3, %p42_p0  ;;  %p163_p7 = scmp.lt.s32.totalorder %s1394_s21, 3 }
   0xb   : > { %s1758_s24 = scalar_select %p1464_p4, 1, 0 }
   0xc   : > { %s1759_s25 = scalar_select %p1469_p6, 1, 0 }
   0xd   : > { %p1474_p8 = pnand %p930_p5, %p163_p7  ;;  %s1396_s27 = smov [#allocation5]  }
   0xe   : > { %s175_s28 = sshll.u32 %s1396_s27, 4  ;;  %s1397_s30 = smov [#allocation7]   ;;  %s176_s28 = int_to_ptr.vmem [resolvable:$true] %s175_s28 }
   0xf   : > { %s1760_s26 = scalar_select %p1474_p8, 1, 0 }
  0x10   : > { %p1187_p9 = pneg %p1474_p8  ;;  %s191_s6 = sshll.u32 %s1397_s30, 4  ;;  %s192_s6 = int_to_ptr.vmem [resolvable:$true] %s191_s6 }
  0x11   : > { %s1257_s7 = scalar_lea.vmem %s176_s28, 6144  ;;  %p1265_p5 = scmp.lt.s32.totalorder %s176_s28, %s176_s28 }
  0x12   : > { %p1483_p11 = pnand %p1187_p9, %p1753_p1  ;;  %p1258_p13 = scmp.ne.s32.totalorder %s176_s28, %s1257_s7 }
  0x13   : > { %p1266_p7 = scmp.lt.s32.totalorder %s1257_s7, %s1257_s7 }
  0x14   : > { %p1248_p12 = pneg %p1483_p11 }
  0x15   : > { %p1267_p10 = por %p1266_p7, %p1265_p5 }
  0x16   : > { %p1260_p0 = pnand %p1258_p13, %p1248_p12 }
  0x18   : > { %p1261_p3 = pneg %p1260_p0 }
  0x1a   : > { %p1268_p9 = pnand %p1267_p10, %p1261_p3 }
  0x1c   : > { %1271 = shalt.err (!%p1268_p9)
}
  0x1d   : > { %s1754_s8 = smov 128   ;;  %s1399_s9 = smov 8  }
  0x1e   : > { %1190 = dma.hbm_to_vmem [thread:$0]  (!%p1483_p11), %s1748_s1, 6144, %s176_s28, [#allocation6], %s1754_s8, %s1754_s8, %s1399_s9  }
  0x1f   : > { %s1283_s12 = scalar_lea.vmem %s192_s6, 6144  ;;  %p1291_p10 = scmp.lt.s32.totalorder %s192_s6, %s192_s6 }
  0x20   : > { %p1284_p13 = scmp.ne.s32.totalorder %s192_s6, %s1283_s12  ;;  %p1292_p3 = scmp.lt.s32.totalorder %s1283_s12, %s1283_s12 }
  0x22   : > { %p1286_p0 = pnand %p1284_p13, %p1248_p12  ;;  %p1293_p7 = por %p1292_p3, %p1291_p10 }
  0x24   : > { %p1287_p5 = pneg %p1286_p0 }
  0x26   : > { %p1294_p9 = pnand %p1293_p7, %p1287_p5 }
  0x28   : > { %1297 = shalt.err (!%p1294_p9)
}
  0x29   : > { %1193 = dma.hbm_to_vmem [thread:$0]  (!%p1483_p11), %s1750_s3, 6144, %s192_s6, [#allocation6], %s1754_s8, %s1754_s8, %s1399_s9  }
  0x2a   : > { %s1512_s15 = sadd.s32 1, %s1394_s21   ;;  %s29_s16 = sadd.s32 1, %s1390_s20 }
  0x2b   : > { %s26_s17 = ssub.s32 %s1394_s21, %s1512_s15  ;;  %p36_p12 = scmp.ne.s32.totalorder %s1390_s20, %s1386_s19 }
  0x2c   : > { %p27_p13 = scmp.eq.s32.totalorder %s26_s17, 0  ;;  %p37_p0 = scmp.eq.s32.totalorder %s1394_s21, 0 }
  0x2d   : > { %p1522_p5 = por %p150_p2, %p36_p12  ;;  %p1204_p10 = scmp.lt.s32.totalorder %s1394_s21, 2 }
  0x2e   : > { %s1528_s27 = scalar_select %p27_p13, %s1390_s20, %s29_s16  }
  0x2f   : > { %s1762_s23 = scalar_select %p1522_p5, 1, 0 }
  0x30   : > { %p38_p3 = por %p37_p0, %p36_p12  ;;  %s208_s28 = sand.u32 1, %s1390_s20  }
  0x31   : > { %s934_s29 = sshll.u32 %s208_s28, 5  ;;  %s965_s30 = sshll.u32 %s1394_s21, 9 }
  0x32   : > { %s1535_s10 = scalar_lea.hbm %s1747_s0, %s965_s30  ;;  %s212_s11 = scalar_lea.vmem [#allocation2], %s934_s29 }
  0x33   : > { %s219_s12 = sshll.u32 %s212_s11, 4  ;;  %p1539_p2 = pnand %p1204_p10, %p38_p3  ;;  %s1537_s12 = int_to_ptr.vmem [resolvable:$true] %s219_s12 }
  0x34   : > { %s1543_s14 = scalar_lea.sflag [#allocation3], %s208_s28  ;;  %s1298_s16 = scalar_lea.hbm %s1535_s10, 512 }
  0x35   : > { %p1299_p11 = scmp.ne.s32.totalorder %s1535_s10, %s1298_s16  ;;  %p1300_p7 = pneg %p1539_p2 }
  0x36   : > { %s1303_s29 = scalar_lea.hbm %s1747_s0, 1024  ;;  %p1304_p13 = scmp.lt.s32.totalorder %s1535_s10, %s1747_s0 }
  0x37   : > { %p1301_p9 = pnand %p1300_p7, %p1299_p11  ;;  %p1305_p0 = scmp.lt.s32.totalorder %s1303_s29, %s1298_s16 }
  0x39   : > { %p1302_p12 = pneg %p1301_p9  ;;  %p1306_p10 = por %p1305_p0, %p1304_p13 }
  0x3b   : > { %p1307_p3 = pnand %p1306_p10, %p1302_p12 }
  0x3d   : > { %1310 = shalt.err (!%p1307_p3)
}
  0x3e   : > { %s1311_s28 = scalar_lea.vmem %s1537_s12, 512  ;;  %s1400_s11 = smov [#allocation2]  }
  0x3f   : > { %p1312_p1 = scmp.ne.s32.totalorder %s1537_s12, %s1311_s28  ;;  %s1316_s8 = sshll.u32 %s1400_s11, 4  ;;  %s1317_s8 = int_to_ptr.vmem [resolvable:$false] %s1316_s8 }
  0x40   : > { %s1318_s17 = scalar_lea.vmem %s1317_s8, 1024  ;;  %p1319_p9 = scmp.lt.s32.totalorder %s1537_s12, %s1317_s8 }
  0x41   : > { %p1314_p6 = pnand %p1312_p1, %p1300_p7  ;;  %p1320_p5 = scmp.lt.s32.totalorder %s1318_s17, %s1311_s28 }
  0x43   : > { %p1315_p11 = pneg %p1314_p6  ;;  %p1321_p4 = por %p1320_p5, %p1319_p9 }
  0x45   : > { %p1322_p8 = pnand %p1321_p4, %p1315_p11 }
  0x47   : > { %1325 = shalt.err (!%p1322_p8)
}
  0x48   : > { %s1764_s16 = smov 128   ;;  %p1765_p1 = scmp.ne.s32.totalorder %s1760_s26, 0 }
  0x49   : > { %1197 = dma.hbm_to_vmem [thread:$0]  (!%p1539_p2), %s1535_s10, 512, %s1537_s12, %s1543_s14, %s1764_s16, %s1764_s16, %s1399_s9  }
  0x4a   : > { %231 = sbr.rel (%p1765_p1) target bundleno = 563 (0x233), region = 40  ;;  %s1570_s30 = sand.u32 (!%p1765_p1), 1, %s1386_s19  }
  0x4b   : > { %s938_s8 = sshll.u32 (!%p1765_p1), %s1570_s30, 5  ;;  %s234_s29 = scalar_lea.sflag (!%p1765_p1), [#allocation3], %s1570_s30 }
  0x4c   : > { %s1576_s13 = scalar_lea.vmem (!%p1765_p1), [#allocation2], %s938_s8  ;;  %p1766_p4 = scmp.ne.s32.totalorder (!%p1765_p1), %s1758_s24, 0 }
  0x4f   : > { %1369 = dma.done.wait (%p1766_p4), %s234_s29, 512  }
  0x50   : > { %1371 = vsyncadd (%p1766_p4), %s234_s29, 4294966784  ;;  %p1767_p6 = scmp.eq.s32.totalorder %s1455_s22, 0 }
  0x52   : > { %1373 = dma.done.wait (%p1767_p6), [#allocation6], 12288   ;;  %p1768_p8 = pmov %p1767_p6 }
  0x53   : > { %v368_v0 = vld [vmem:[#allocation5 + $0xf8] sm:$0xff]  ;;  %v367_v2 = vld [vmem:[#allocation5 + $0xf0] sm:$0xff]  ;;  %v366_v5 = vld [vmem:[#allocation5 + $0xe8] sm:$0xff]  ;;  %v274_v31 = vlaneseq  ;;  %s271_s12 = scalar_lea.vmem [#allocation8], %s938_s8  ;;  %s966_s6 = sshll.u32 %s1455_s22, 9 }
  0x54   : > { %1375 = vsyncadd (%p1768_p8), [#allocation6], 4294955008  ;;  %v352_v1 = vld [vmem:[#allocation5 + $0x78] sm:$0xff]  ;;  %971 = vmatprep.subr.mxu0 %v368_v0  ;;  %v351_v3 = vld [vmem:[#allocation5 + $0x70] sm:$0xff]  ;;  %s837_s14 = sshll.u32 %s271_s12, 4  ;;  %s1703_s11 = scalar_lea.hbm %s1752_s5, %s966_s6  ;;  %s1698_s14 = int_to_ptr.vmem [resolvable:$true] %s837_s14 }
  0x55   : > { %v384_v4 = vld [vmem:[#allocation5 + $0x178] sm:$0xff]  ;;  %972 = vmatpush3.msra.mxu0 %v352_v1  ;;  %v383_v6 = vld [vmem:[#allocation5 + $0x170] sm:$0xff]  ;;  %v350_v7 = vld [vmem:[#allocation5 + $0x68] sm:$0xff]  ;;  %v1586_v39 = vshrl.u32 %v274_v31, 7  ;;  %s824_s17 = scalar_lea.sflag [#allocation4], %s1570_s30  ;;  %s1326_s16 = scalar_lea.vmem %s1698_s14, 512 }
  0x56   : > { %1099 = vmatprep.subr.mxu1 %v384_v4  ;;  %973 = vmatprep.subr.mxu0 %v367_v2  ;;  %v382_v8 = vld [vmem:[#allocation5 + $0x168] sm:$0xff]  ;;  %v365_v9 = vld [vmem:[#allocation5 + $0xe0] sm:$0xff]  ;;  %v364_v12 = vld [vmem:[#allocation5 + $0xd8] sm:$0xff]  ;;  %p1327_p5 = scmp.ne.s32.totalorder %s1698_s14, %s1326_s16  ;;  %p1777_p2 = scmp.ne.s32.totalorder %s1762_s23, 0 }
  0x57   : > { %1100 = vmatpush3.msra.mxu1 %v384_v4  ;;  %974 = vmatpush3.msra.mxu0 %v351_v3  ;;  %v349_v10 = vld [vmem:[#allocation5 + $0x60] sm:$0xff]  ;;  %v348_v13 = vld [vmem:[#allocation5 + $0x58] sm:$0xff]  ;;  %v363_v15 = vld [vmem:[#allocation5 + $0xd0] sm:$0xff]  ;;  %v276_v47 = vadd.s32 8, %v1586_v39  ;;  %v279_v50 = vand.u32 15, %v1586_v39  ;;  %vm299_vm0 = vcmp.lt.s32.totalorder %v1586_v39, 1 }
  0x58   : > { %1101 = vmatprep.subr.mxu1 %v383_v6  ;;  %975 = vmatprep.subr.mxu0 %v366_v5  ;;  %v381_v11 = vld [vmem:[#allocation5 + $0x160] sm:$0xff]  ;;  %v380_v14 = vld [vmem:[#allocation5 + $0x158] sm:$0xff]  ;;  %v347_v16 = vld [vmem:[#allocation5 + $0x50] sm:$0xff]  ;;  %vm320_vm1 = vcmp.lt.s32.totalorder %v1586_v39, 7  ;;  %v277_v61 = vadd.s32 16, %v1586_v39  ;;  %v278_v62 = vadd.s32 24, %v1586_v39  ;;  %p1328_p7 = pnand %p1327_p5, %p1777_p2 }
  0x59   : > { %1102 = vmatpush3.msra.mxu1 %v383_v6  ;;  %976 = vmatpush3.msra.mxu0 %v350_v7  ;;  %v379_v17 = vld [vmem:[#allocation5 + $0x150] sm:$0xff]  ;;  %v362_v18 = vld [vmem:[#allocation5 + $0xc8] sm:$0xff]  ;;  %v361_v21 = vld [vmem:[#allocation5 + $0xc0] sm:$0xff]  ;;  %v280_v59 = vand.u32 15, %v276_v47  ;;  %vm1616_vm2 = vcmp.ne.s32.totalorder %v279_v50, 0  ;;  %s1401_s22 = smov [#allocation8]  }
  0x5a   : > { %1103 = vmatprep.subr.mxu1 %v382_v8  ;;  %977 = vmatprep.subr.mxu0 %v365_v9  ;;  %v346_v19 = vld [vmem:[#allocation5 + $0x48] sm:$0xff]  ;;  %v345_v22 = vld [vmem:[#allocation5 + $0x40] sm:$0xff]  ;;  %v360_v24 = vld [vmem:[#allocation5 + $0xb8] sm:$0xff]  ;;  %p1329_p12 = pneg %p1328_p7  ;;  %s1330_s8 = sshll.u32 %s1401_s22, 4  ;;  %s1331_s8 = int_to_ptr.vmem [resolvable:$false] %s1330_s8 }
  0x5b   : > { %1104 = vmatpush3.msra.mxu1 %v382_v8  ;;  %978 = vmatpush3.msra.mxu0 %v349_v10  ;;  %v378_v20 = vld [vmem:[#allocation5 + $0x148] sm:$0xff]  ;;  %v377_v23 = vld [vmem:[#allocation5 + $0x140] sm:$0xff]  ;;  %v344_v25 = vld [vmem:[#allocation5 + $0x38] sm:$0xff]  ;;  %vm1628_vm3 = vcmp.ne.s32.totalorder %v280_v59, 15  ;;  %v282_v8 = vand.u32 15, %v278_v62  ;;  %s1332_s29 = scalar_lea.vmem %s1331_s8, 1024  ;;  %p1333_p13 = scmp.lt.s32.totalorder %s1698_s14, %s1331_s8 }
  0x5c   : > { %1105 = vmatprep.subr.mxu1 %v381_v11  ;;  %979 = vmatprep.subr.mxu0 %v364_v12  ;;  %v376_v26 = vld [vmem:[#allocation5 + $0x138] sm:$0xff]  ;;  %v359_v27 = vld [vmem:[#allocation5 + $0xb0] sm:$0xff]  ;;  %v358_v30 = vld [vmem:[#allocation5 + $0xa8] sm:$0xff]  ;;  %p1334_p0 = scmp.lt.s32.totalorder %s1332_s29, %s1326_s16 }
  0x5d   : > { %1106 = vmatpush3.msra.mxu1 %v381_v11  ;;  %980 = vmatpush3.msra.mxu0 %v348_v13  ;;  %v343_v28 = vld [vmem:[#allocation5 + $0x30] sm:$0xff]  ;;  %v342_v32 = vld [vmem:[#allocation5 + $0x28] sm:$0xff]  ;;  %v357_v34 = vld [vmem:[#allocation5 + $0xa0] sm:$0xff]  ;;  %v281_v11 = vand.u32 15, %v277_v61  ;;  %vm1642_vm4 = vcmp.ne.s32.totalorder %v282_v8, 15 }
  0x5e   : > { %1107 = vmatprep.subr.mxu1 %v380_v14  ;;  %981 = vmatprep.subr.mxu0 %v363_v15  ;;  %v375_v29 = vld [vmem:[#allocation5 + $0x130] sm:$0xff]  ;;  %v374_v33 = vld [vmem:[#allocation5 + $0x128] sm:$0xff]  ;;  %v341_v35 = vld [vmem:[#allocation5 + $0x20] sm:$0xff]  ;;  %p1335_p10 = por %p1334_p0, %p1333_p13 }
  0x5f   : > { %1108 = vmatpush3.msra.mxu1 %v380_v14  ;;  %982 = vmatpush3.msra.mxu0 %v347_v16  ;;  %v373_v36 = vld [vmem:[#allocation5 + $0x120] sm:$0xff]  ;;  %v356_v37 = vld [vmem:[#allocation5 + $0x98] sm:$0xff]  ;;  %v355_v43 = vld [vmem:[#allocation5 + $0x90] sm:$0xff]  ;;  %vm1649_vm5 = vcmp.ne.s32.totalorder %v281_v11, 0 }
  0x60   : > { %1109 = vmatprep.subr.mxu1 %v379_v17  ;;  %983 = vmatprep.subr.mxu0 %v362_v18  ;;  %v340_v38 = vld [vmem:[#allocation5 + $0x18] sm:$0xff]  ;;  %v1589_v41 = vld [vmem:[%s1576_s13] sm:$0xff]  ;;  %v339_v44 = vld [vmem:[#allocation5 + $0x10] sm:$0xff]  ;;  %p1336_p3 = pnand %p1335_p10, %p1329_p12 }
  0x61   : > { %1110 = vmatpush3.msra.mxu1 %v379_v17  ;;  %984 = vmatpush3.msra.mxu0 %v346_v19  ;;  %v372_v40 = vld [vmem:[#allocation5 + $0x118] sm:$0xff]  ;;  %v371_v45 = vld [vmem:[#allocation5 + $0x110] sm:$0xff]  ;;  %v1595_v46 = vld [vmem:[%s1576_s13 + $0x8] sm:$0xff]  ;;  %v295_v49 = vrot.slane %v1589_v41, 7  ;;  %v316_v56 = vrot.slane %v1589_v41, 1 }
  0x62   : > { %1111 = vmatprep.subr.mxu1 %v378_v20  ;;  %985 = vmatprep.subr.mxu0 %v361_v21  ;;  %v1592_v42 = vld [vmem:[%s1576_s13 + $0x18] sm:$0xff]  ;;  %v354_v48 = vld [vmem:[#allocation5 + $0x88] sm:$0xff]  ;;  %v1602_v52 = vld [vmem:[%s1576_s13 + $0x10] sm:$0xff]  ;;  %v317_v57 = vrot.slane %v1595_v46, 1  ;;  %v296_v2 = vrot.slane %v1595_v46, 7 }
  0x63   : > { %1112 = vmatpush3.msra.mxu1 %v378_v20  ;;  %986 = vmatpush3.msra.mxu0 %v345_v22  ;;  %v298_v51 = vrot.slane %v1592_v42, 7  ;;  %v338_v53 = vld [vmem:[#allocation5 + $0x8] sm:$0xff]  ;;  %v353_v54 = vld [vmem:[#allocation5 + $0x80] sm:$0xff]  ;;  %v318_v60 = vrot.slane %v1602_v52, 1  ;;  %v319_v3 = vrot.slane %v1592_v42, 1  ;;  %v637_v5 = vld [vmem:[#allocation7 + $0x178] sm:$0xff] }
  0x64   : > { %1113 = vmatprep.subr.mxu1 %v377_v23  ;;  %987 = vmatprep.subr.mxu0 %v360_v24  ;;  %v370_v55 = vld [vmem:[#allocation5 + $0x108] sm:$0xff]  ;;  %v337_v58 = vld [vmem:[#allocation5] sm:$0xff]  ;;  %v323_v4 = vsel %vm320_vm1, %v316_v56, %v317_v57  ;;  %v621_v9 = vld [vmem:[#allocation7 + $0xf8] sm:$0xff]  ;;  %v302_v10 = vsel %vm299_vm0, %v295_v49, %v296_v2  ;;  %v297_v12 = vrot.slane %v1602_v52, 7 }
  0x65   : > { %1114 = vmatpush3.msra.mxu1 %v377_v23  ;;  %988 = vmatpush3.msra.mxu0 %v344_v25  ;;  %v303_v63 = vsel %vm299_vm0, %v298_v51, %v295_v49  ;;  %v369_v1 = vld [vmem:[#allocation5 + $0x100] sm:$0xff]  ;;  %v322_v6 = vsel %vm320_vm1, %v317_v57, %v318_v60  ;;  %v321_v13 = vsel %vm320_vm1, %v318_v60, %v319_v3  ;;  %v636_v14 = vld [vmem:[#allocation7 + $0x170] sm:$0xff]  ;;  %v605_v15 = vld [vmem:[#allocation7 + $0x78] sm:$0xff] }
  0x66   : > { %1115 = vmatprep.subr.mxu1 %v376_v26  ;;  %989 = vmatprep.subr.mxu0 %v359_v27  ;;  %v324_v16 = vsel %vm320_vm1, %v319_v3, %v316_v56  ;;  %v620_v18 = vld [vmem:[#allocation7 + $0xf0] sm:$0xff]  ;;  %v301_v19 = vsel %vm299_vm0, %v296_v2, %v297_v12  ;;  %v635_v21 = vld [vmem:[#allocation7 + $0x168] sm:$0xff]  ;;  %v634_v23 = vld [vmem:[#allocation7 + $0x160] sm:$0xff]  ;;  %v300_v25 = vsel %vm299_vm0, %v297_v12, %v298_v51 }
  0x67   : > { %1116 = vmatpush3.msra.mxu1 %v376_v26  ;;  %990 = vmatpush3.msra.mxu0 %v343_v28  ;;  %v604_v22 = vld [vmem:[#allocation7 + $0x70] sm:$0xff]  ;;  %v619_v24 = vld [vmem:[#allocation7 + $0xe8] sm:$0xff]  ;;  %v633_v26 = vld [vmem:[#allocation7 + $0x158] sm:$0xff] }
  0x68   : > { %1117 = vmatprep.subr.mxu1 %v375_v29  ;;  %991 = vmatprep.subr.mxu0 %v358_v30  ;;  %v603_v27 = vld [vmem:[#allocation7 + $0x68] sm:$0xff]  ;;  %v618_v28 = vld [vmem:[#allocation7 + $0xe0] sm:$0xff]  ;;  %v617_v31 = vld [vmem:[#allocation7 + $0xd8] sm:$0xff] }
  0x69   : > { %1118 = vmatpush3.msra.mxu1 %v375_v29  ;;  %992 = vmatpush3.msra.mxu0 %v342_v32  ;;  %v632_v29 = vld [vmem:[#allocation7 + $0x150] sm:$0xff]  ;;  %v602_v30 = vld [vmem:[#allocation7 + $0x60] sm:$0xff]  ;;  %v631_v32 = vld [vmem:[#allocation7 + $0x148] sm:$0xff] }
  0x6a   : > { %1119 = vmatprep.subr.mxu1 %v374_v33  ;;  %993 = vmatprep.subr.mxu0 %v357_v34  ;;  %v616_v34 = vld [vmem:[#allocation7 + $0xd0] sm:$0xff]  ;;  %v613_v47 = vld [vmem:[#allocation7 + $0xb8] sm:$0xff]  ;;  %v626_v51 = vld [vmem:[#allocation7 + $0x120] sm:$0xff] }
  0x6b   : > { %1120 = vmatpush3.msra.mxu1 %v374_v33  ;;  %994 = vmatpush3.msra.mxu0 %v341_v35  ;;  %v601_v33 = vld [vmem:[#allocation7 + $0x58] sm:$0xff]  ;;  %v630_v35 = vld [vmem:[#allocation7 + $0x140] sm:$0xff]  ;;  %v612_v50 = vld [vmem:[#allocation7 + $0xb0] sm:$0xff] }
  0x6c   : > { %1121 = vmatprep.subr.mxu1 %v373_v36  ;;  %995 = vmatprep.subr.mxu0 %v356_v37  ;;  %v615_v37 = vld [vmem:[#allocation7 + $0xc8] sm:$0xff]  ;;  %v597_v49 = vld [vmem:[#allocation7 + $0x38] sm:$0xff]  ;;  %v610_v57 = vld [vmem:[#allocation7 + $0xa0] sm:$0xff] }
  0x6d   : > { %1122 = vmatpush3.msra.mxu1 %v373_v36  ;;  %996 = vmatpush3.msra.mxu0 %v340_v38  ;;  %v600_v36 = vld [vmem:[#allocation7 + $0x50] sm:$0xff]  ;;  %v629_v38 = vld [vmem:[#allocation7 + $0x138] sm:$0xff]  ;;  %v595_v56 = vld [vmem:[#allocation7 + $0x28] sm:$0xff] }
  0x6e   : > { %1123 = vmatprep.subr.mxu1 %v372_v40  ;;  %997 = vmatprep.subr.mxu0 %v355_v43  ;;  %v614_v43 = vld [vmem:[#allocation7 + $0xc0] sm:$0xff]  ;;  %v609_v60 = vld [vmem:[#allocation7 + $0x98] sm:$0xff]  ;;  %v623_v61 = vld [vmem:[#allocation7 + $0x108] sm:$0xff] }
  0x6f   : > { %1124 = vmatpush3.msra.mxu1 %v372_v40  ;;  %998 = vmatpush3.msra.mxu0 %v339_v44  ;;  %v599_v40 = vld [vmem:[#allocation7 + $0x48] sm:$0xff]  ;;  %v628_v44 = vld [vmem:[#allocation7 + $0x130] sm:$0xff]  ;;  %v594_v59 = vld [vmem:[#allocation7 + $0x20] sm:$0xff] }
  0x70   : > { %1125 = vmatprep.subr.mxu1 %v371_v45  ;;  %999 = vmatprep.subr.mxu0 %v354_v48  ;;  %v627_v48 = vld [vmem:[#allocation7 + $0x128] sm:$0xff]  ;;  %v593_v62 = vld [vmem:[#allocation7 + $0x18] sm:$0xff]  ;;  %v592_v2 = vld [vmem:[#allocation7 + $0x10] sm:$0xff] }
  0x71   : > { %456 = vmatprep.mubr.f32.mxu0 %v1589_v41  ;;  %1000 = vmatpush3.msra.mxu0 %v338_v53  ;;  %v596_v53 = vld [vmem:[#allocation7 + $0x30] sm:$0xff]  ;;  %v607_v3 = vld [vmem:[#allocation7 + $0x88] sm:$0xff] }
  0x72   : > { %1126 = vmatpush3.msra.mxu1 %v371_v45  ;;  %1001 = vmatprep.subr.mxu0 %v353_v54  ;;  %v598_v45 = vld [vmem:[#allocation7 + $0x40] sm:$0xff]  ;;  %v611_v54 = vld [vmem:[#allocation7 + $0xa8] sm:$0xff] }
  0x73   : > { %1127 = vmatprep.subr.mxu1 %v370_v55  ;;  %1002 = vmatpush3.msra.mxu0 %v337_v58  ;;  %v624_v58 = vld [vmem:[#allocation7 + $0x110] sm:$0xff] }
  0x74   : > { %1128 = vmatpush3.msra.mxu1 %v370_v55  ;;  %944 = vmatmul.mubr.msk.f32.vlgmr.msra.gmra.mxu0 %vm1616_vm2, %v303_v63  ;;  %v625_v55 = vld [vmem:[#allocation7 + $0x118] sm:$0xff]  ;;  %v608_v63 = vld [vmem:[#allocation7 + $0x90] sm:$0xff] }
  0x75   : > { %1129 = vmatprep.subr.mxu1 %v369_v1  ;;  %461 = vmatprep.mubr.f32.mxu0 %v1595_v46 }
  0x76   : > { %1130 = vmatpush3.msra.mxu1 %v369_v1  ;;  %1131 = vmatprep.mubr.f32.mxu1 %v323_v4  ;;  %v622_v1 = vld [vmem:[#allocation7 + $0x100] sm:$0xff]  ;;  %v591_v4 = vld [vmem:[#allocation7 + $0x8] sm:$0xff] }
  0x77   : > { %1137 = vmatprep.subr.mxu1 %v637_v5  ;;  %1132 = vmatmul.mubr.msk.f32.vlgmr.msra.gmra.mxu1 %vm1628_vm3, %v322_v6  ;;  %v590_v6 = vld [vmem:[#allocation7] sm:$0xff] }
  0x78   : > { %1035 = vmatprep.subr.mxu0 %v621_v9  ;;  %462 = vmatmul.mubr.f32.gmra.mxu0 %v302_v10  ;;  %v942_v10 = vld [vmem:[%s1749_s2] ss:$0 sm:$0xff] }
  0x79   : > { %1134 = vmatprep.mubr.f32.mxu1 %v321_v13  ;;  %466 = vmatprep.mubr.f32.mxu0 %v1602_v52 }
  0x7a   : > { %1138 = vmatpush3.msra.mxu1 %v637_v5  ;;  %1036 = vmatpush3.msra.mxu0 %v605_v15  ;;  %v606_v5 = vld [vmem:[#allocation7 + $0x80] sm:$0xff] }
  0x7b   : > { %1139 = vmatprep.subr.mxu1 %v636_v14  ;;  %1135 = vmatmul.mubr.msk.f32.gmra.mxu1 %vm1642_vm4, %v324_v16 }
  0x7c   : > { %1037 = vmatprep.subr.mxu0 %v620_v18  ;;  %946 = vmatmul.mubr.msk.f32.gmra.mxu0 %vm1649_vm5, %v301_v19 }
  0x7d   : > { %1140 = vmatpush3.msra.mxu1 %v636_v14  ;;  %471 = vmatprep.mubr.f32.mxu0 %v1592_v42 }
  0x7e   : > { %1141 = vmatprep.subr.mxu1 %v635_v21  ;;  %1038 = vmatpush3.msra.mxu0 %v604_v22 }
  0x7f   : > { %1142 = vmatpush3.msra.mxu1 %v635_v21  ;;  %1039 = vmatprep.subr.mxu0 %v619_v24 }
  0x80   : > { %1143 = vmatprep.subr.mxu1 %v634_v23  ;;  %472 = vmatmul.mubr.f32.gmra.mxu0 %v300_v25 }
  0x81   : > { %1144 = vmatpush3.msra.mxu1 %v634_v23  ;;  %1040 = vmatpush3.msra.mxu0 %v603_v27 }
  0x82   : > { %1145 = vmatprep.subr.mxu1 %v633_v26  ;;  %1041 = vmatprep.subr.mxu0 %v618_v28 }
  0x83   : > { %1146 = vmatpush3.msra.mxu1 %v633_v26  ;;  %1042 = vmatpush3.msra.mxu0 %v602_v30 }
  0x84   : > { %1147 = vmatprep.subr.mxu1 %v632_v29  ;;  %1043 = vmatprep.subr.mxu0 %v617_v31 }
  0x85   : > { %1148 = vmatpush3.msra.mxu1 %v632_v29  ;;  %1044 = vmatpush3.msra.mxu0 %v601_v33 }
  0x86   : > { %1149 = vmatprep.subr.mxu1 %v631_v32  ;;  %1045 = vmatprep.subr.mxu0 %v616_v34 }
  0x87   : > { %1150 = vmatpush3.msra.mxu1 %v631_v32  ;;  %1046 = vmatpush3.msra.mxu0 %v600_v36 }
  0x88   : > { %1151 = vmatprep.subr.mxu1 %v630_v35  ;;  %1047 = vmatprep.subr.mxu0 %v615_v37 }
  0x89   : > { %1152 = vmatpush3.msra.mxu1 %v630_v35  ;;  %1048 = vmatpush3.msra.mxu0 %v599_v40 }
  0x8a   : > { %1153 = vmatprep.subr.mxu1 %v629_v38  ;;  %1049 = vmatprep.subr.mxu0 %v614_v43 }
  0x8b   : > { %1154 = vmatpush3.msra.mxu1 %v629_v38  ;;  %1050 = vmatpush3.msra.mxu0 %v598_v45 }
  0x8c   : > { %1155 = vmatprep.subr.mxu1 %v628_v44  ;;  %1051 = vmatprep.subr.mxu0 %v613_v47 }
  0x8d   : > { %1156 = vmatpush3.msra.mxu1 %v628_v44  ;;  %1052 = vmatpush3.msra.mxu0 %v597_v49 }
  0x8e   : > { %1157 = vmatprep.subr.mxu1 %v627_v48  ;;  %1053 = vmatprep.subr.mxu0 %v612_v50 }
  0x8f   : > { %1158 = vmatpush3.msra.mxu1 %v627_v48  ;;  %1054 = vmatpush3.msra.mxu0 %v596_v53 }
  0x90   : > { %1159 = vmatprep.subr.mxu1 %v626_v51  ;;  %1055 = vmatprep.subr.mxu0 %v611_v54 }
  0x91   : > { %1160 = vmatpush3.msra.mxu1 %v626_v51  ;;  %1056 = vmatpush3.msra.mxu0 %v595_v56 }
  0x92   : > { %1161 = vmatprep.subr.mxu1 %v625_v55  ;;  %1057 = vmatprep.subr.mxu0 %v610_v57 }
  0x93   : > { %1162 = vmatpush3.msra.mxu1 %v625_v55  ;;  %1058 = vmatpush3.msra.mxu0 %v594_v59  ;;  %v951_v59 = vld [vmem:[%s1751_s4] ss:$0 sm:$0xff] }
  0x94   : > { %1163 = vmatprep.subr.mxu1 %v624_v58  ;;  %1059 = vmatprep.subr.mxu0 %v609_v60 }
  0x95   : > { %1164 = vmatpush3.msra.mxu1 %v624_v58  ;;  %1060 = vmatpush3.msra.mxu0 %v593_v62 }
  0x96   : > { %1165 = vmatprep.subr.mxu1 %v623_v61  ;;  %1061 = vmatprep.subr.mxu0 %v608_v63 }
  0x97   : > { %1166 = vmatpush3.msra.mxu1 %v623_v61  ;;  %1062 = vmatpush3.msra.mxu0 %v592_v2 }
  0x98   : > { %1167 = vmatprep.subr.mxu1 %v622_v1  ;;  %1063 = vmatprep.subr.mxu0 %v607_v3 }
  0x99   : > { %1168 = vmatpush3.msra.mxu1 %v622_v1  ;;  %1064 = vmatpush3.msra.mxu0 %v591_v4 }
  0x9a   : > { %1065 = vmatprep.subr.mxu0 %v606_v5 }
  0x9b   : > { %1066 = vmatpush3.msra.mxu0 %v590_v6 }
 0x134   : > { %v1003_v8 = vpop.f32.mrf.mxu0 }
 0x136   : > { %v1004_v9 = vpop.f32.mrf.mxu0 }
 0x137   : > { %v1005_v11 = vadd.f32 %v1004_v9, %v1003_v8  ;;  %v1133_v12 = vpop.f32.mrf.mxu1 }
 0x138   : > { %v1006_v13 = vpop.f32.mrf.mxu0 }
 0x139   : > { %v459_v14 = vadd.f32 %v1005_v11, %v942_v10  ;;  %v543_v15 = vpop.f32.mrf.mxu1 }
 0x13a   : > { %v1007_v16 = vpop.f32.mrf.mxu0 }
 0x13b   : > { %v1008_v18 = vadd.f32 %v1007_v16, %v1006_v13  ;;  %v544_v19 = vadd.f32 %v543_v15, %v459_v14  ;;  %v1136_v22 = vpop.f32.mrf.mxu1 }
 0x13c   : > { %v1009_v21 = vpop.f32.mrf.mxu0 }
 0x13d   : > { %v464_v23 = vadd.f32 %v1008_v18, %v942_v10  ;;  %v562_v24 = vmax.f32 %v544_v19, 0.0  ;;  %v553_v29 = vpop.f32.mrf.mxu1 }
 0x13e   : > { %v1010_v25 = vpop.f32.mrf.mxu0 }
 0x13f   : > { %v549_v26 = vadd.f32 %v1133_v12, %v464_v23  ;;  %v1011_v27 = vadd.f32 %v1010_v25, %v1009_v21  ;;  %709 = vmatprep.mubr.f32.mxu0 %v562_v24  ;;  %v578_v33 = vrot.slane %v562_v24, 1  ;;  %v566_v48 = vrot.slane %v562_v24, 7 }
 0x140   : > { %v1012_v28 = vpop.f32.mrf.mxu0 }
 0x141   : > { %v563_v30 = vmax.f32 %v549_v26, 0.0  ;;  %v469_v31 = vadd.f32 %v1011_v27, %v942_v10 }
 0x142   : > { %v1013_v32 = vpop.f32.mrf.mxu0 }
 0x143   : > { %v1014_v34 = vadd.f32 %v1013_v32, %v1012_v28  ;;  %v554_v35 = vadd.f32 %v553_v29, %v469_v31  ;;  %v579_v36 = vrot.slane %v563_v30, 1  ;;  %v567_v55 = vrot.slane %v563_v30, 7 }
 0x145   : > { %v474_v37 = vadd.f32 %v1014_v34, %v942_v10  ;;  %v564_v38 = vmax.f32 %v554_v35, 0.0  ;;  %v584_v40 = vsel %vm320_vm1, %v578_v33, %v579_v36  ;;  %v572_v56 = vsel %vm299_vm0, %v566_v48, %v567_v55 }
 0x146   : > { %1169 = vmatprep.mubr.f32.mxu1 %v584_v40 }
 0x147   : > { %v559_v43 = vadd.f32 %v1136_v22, %v474_v37  ;;  %v580_v44 = vrot.slane %v564_v38, 1  ;;  %v568_v7 = vrot.slane %v564_v38, 7 }
 0x149   : > { %v565_v45 = vmax.f32 %v559_v43, 0.0  ;;  %v583_v47 = vsel %vm320_vm1, %v579_v36, %v580_v44  ;;  %v571_v57 = vsel %vm299_vm0, %v567_v55, %v568_v7 }
 0x14a   : > { %1170 = vmatmul.mubr.msk.f32.vlgmr.msra.gmra.mxu1 %vm1628_vm3, %v583_v47 }
 0x14b   : > { %v569_v49 = vrot.slane %v565_v45, 7  ;;  %v581_v50 = vrot.slane %v565_v45, 1 }
 0x14d   : > { %v573_v51 = vsel %vm299_vm0, %v569_v49, %v566_v48  ;;  %v582_v53 = vsel %vm320_vm1, %v580_v44, %v581_v50  ;;  %v585_v54 = vsel %vm320_vm1, %v581_v50, %v578_v33  ;;  %v570_v0 = vsel %vm299_vm0, %v568_v7, %v569_v49 }
 0x14e   : > { %953 = vmatmul.mubr.msk.f32.vlgmr.msra.gmra.mxu0 %vm1616_vm2, %v573_v51  ;;  %1172 = vmatprep.mubr.f32.mxu1 %v582_v53 }
 0x14f   : > { %714 = vmatprep.mubr.f32.mxu0 %v563_v30  ;;  %1173 = vmatmul.mubr.msk.f32.gmra.mxu1 %vm1642_vm4, %v585_v54 }
 0x152   : > { %715 = vmatmul.mubr.f32.gmra.mxu0 %v572_v56 }
 0x153   : > { %719 = vmatprep.mubr.f32.mxu0 %v564_v38 }
 0x156   : > { %955 = vmatmul.mubr.msk.f32.gmra.mxu0 %vm1649_vm5, %v571_v57 }
 0x157   : > { %724 = vmatprep.mubr.f32.mxu0 %v565_v45 }
 0x15a   : > { %725 = vmatmul.mubr.f32.gmra.mxu0 %v570_v0 }
 0x20a   : > { %v1171_v17 = vpop.f32.mrf.mxu1 }
 0x20c   : > { %v796_v1 = vpop.f32.mrf.mxu1 }
 0x20e   : > { %v1067_v58 = vpop.f32.mrf.mxu0 }
 0x20f   : > { %v1174_v6 = vpop.f32.mrf.mxu1 }
 0x210   : > { %v1068_v60 = vpop.f32.mrf.mxu0 }
 0x211   : > { %v1069_v61 = vadd.f32 %v1068_v60, %v1067_v58  ;;  %v806_v14 = vpop.f32.mrf.mxu1 }
 0x212   : > { %v1070_v62 = vpop.f32.mrf.mxu0 }
 0x213   : > { %v712_v63 = vadd.f32 %v1069_v61, %v951_v59 }
 0x214   : > { %v1071_v2 = vpop.f32.mrf.mxu0 }
 0x215   : > { %v797_v20 = vadd.f32 %v796_v1, %v712_v63  ;;  %v1072_v3 = vadd.f32 %v1071_v2, %v1070_v62 }
 0x216   : > { %v1073_v4 = vpop.f32.mrf.mxu0 }
 0x217   : > { %v815_v39 = vadd.f32 %v797_v20, %v1589_v41  ;;  %v717_v5 = vadd.f32 %v1072_v3, %v951_v59 }
 0x218   : > { %v1074_v8 = vpop.f32.mrf.mxu0 }
 0x219   : > { %819 = vst [vmem:[%s271_s12] sm:$0xff] %v815_v39  ;;  %v802_v9 = vadd.f32 %v1171_v17, %v717_v5  ;;  %v1075_v10 = vadd.f32 %v1074_v8, %v1073_v4 }
 0x21a   : > { %v1076_v11 = vpop.f32.mrf.mxu0 }
 0x21b   : > { %v816_v12 = vadd.f32 %v802_v9, %v1595_v46  ;;  %v722_v13 = vadd.f32 %v1075_v10, %v951_v59 }
 0x21c   : > { %v1077_v15 = vpop.f32.mrf.mxu0 }
 0x21d   : > { %820 = vst [vmem:[%s271_s12 + $0x8] sm:$0xff] %v816_v12  ;;  %v807_v16 = vadd.f32 %v806_v14, %v722_v13  ;;  %v1078_v41 = vadd.f32 %v1077_v15, %v1076_v11 }
 0x21f   : > { %v817_v18 = vadd.f32 %v807_v16, %v1602_v52  ;;  %v727_v19 = vadd.f32 %v1078_v41, %v951_v59 }
 0x221   : > { %821 = vst [vmem:[%s271_s12 + $0x10] sm:$0xff] %v817_v18  ;;  %v812_v46 = vadd.f32 %v1174_v6, %v727_v19 }
 0x223   : > { %v818_v21 = vadd.f32 %v812_v46, %v1592_v42 }
 0x225   : > { %822 = vst [vmem:[%s271_s12 + $0x18] sm:$0xff] %v818_v21 }
 0x226   : > { %1339 = shalt.err (!%p1336_p3)
}
 0x227   : > { %s1340_s13 = scalar_lea.hbm %s1703_s11, 512  ;;  %s1344_s9 = scalar_lea.hbm %s1752_s5, 1024 }
 0x228   : > { %p1341_p11 = scmp.ne.s32.totalorder %s1703_s11, %s1340_s13  ;;  %p1345_p4 = scmp.lt.s32.totalorder %s1703_s11, %s1752_s5 }
 0x229   : > { %p1346_p6 = scmp.lt.s32.totalorder %s1344_s9, %s1340_s13 }
 0x22a   : > { %p1342_p9 = pnand %p1341_p11, %p1777_p2 }
 0x22b   : > { %p1347_p8 = por %p1346_p6, %p1345_p4 }
 0x22c   : > { %p1343_p1 = pneg %p1342_p9 }
 0x22e   : > { %p1348_p5 = pnand %p1347_p8, %p1343_p1 }
 0x230   : > { %1351 = shalt.err (!%p1348_p5)
}
 0x231   : > { %s1402_s6 = smov 128   ;;  %s1403_s7 = smov 8  }
 0x232   : > { %1185 = dma.vmem_to_hbm [thread:$0]  (%p1777_p2), %s1698_s14, 512, %s1703_s11, %s824_s17, %s1402_s6, %s1402_s6, %s1403_s7  }
 0x233 PF: > { %s852_s28 = sand.u32 1, %s1382_s18   ;;  %p1778_p7 = scmp.ne.s32.totalorder %s1759_s25, 0 }
 0x234   : > { %p1779_p12 = scmp.ge.s32.totalorder %s1394_s21, 2  ;;  %s853_s16 = scalar_lea.sflag [#allocation4], %s852_s28 }
 0x236   : > { %p1199_p13 = pnand %p1779_p12, %p1778_p7 }
 0x238   : > { %p1200_p0 = pneg %p1199_p13 }
 0x23a   : > { %1377 = dma.done.wait (%p1200_p0), %s853_s16, 512  }
 0x23b   : > { %1379 = vsyncadd (%p1200_p0), %s853_s16, 4294966784  ;;  %p19_p10 = scmp.ge.s32.totalorder %s1512_s15, 4   ;;  %s1780_s18 = smov %s1386_s19 }
 0x23c   : > { %s1781_s19 = smov %s1390_s20  ;;  %s1782_s20 = smov %s1528_s27 }
 0x23d   : > { %s1783_s21 = smov %s1512_s15  ;;  %21 = sbr.rel (!%p19_p10) target bundleno = 6 (0x6), region = 93 }
 0x242   :  { %858 = vsyncpa [#allocation3], 1 }
 0x243   :  { %860 = vsyncpa [#allocation3 + $0x1], 1 }
 0x244   :  { %861 = vsyncpa [#allocation6], 1 }
 0x245   :  { %862 = vsyncpa [#allocation4], 1 }
 0x246   :  { %864 = vsyncpa [#allocation4 + $0x1], 1 }

</bundles_post_ra>
